<compile_context>
chip_gen: v5e
topology: v5e:2x2
jax: 0.10.0
libtpu: 0.0.40
codegen_flags: <defaults>
</compile_context>

<pallas_src>
import functools

import jax
import jax.numpy as jnp
from jax.experimental import pallas as pl
from jax.experimental.pallas import tpu as pltpu


def _partial_label_loss_kernel(score_ref, label_ref, out_ref, *, block_b, total_b):
    """One batch tile: out[r, 0] = lse_r - score[r, label_r] for valid rows, else 0."""
    i = pl.program_id(0)

    # Cast to f32 BEFORE the max/shift so bf16 inputs match score.float() math.
    s = score_ref[...].astype(jnp.float32)                    # (block_b, C) f32
    lab = label_ref[...]                                       # (block_b, 1) int32

    # Global row indices -> mask rows past the end of the (ragged) last tile.
    rows = jax.lax.broadcasted_iota(jnp.int32, (block_b, 1), 0) + i * block_b
    valid = rows < total_b                                      # (block_b, 1) bool

    # Numerically stable logsumexp over the class (lane) axis, with the label
    # gather fused on the same shifted logits t = s - m:
    #   row_loss = lse - picked = log(sum(exp(t))) - sum(onehot * t)
    m = jnp.max(s, axis=-1, keepdims=True)                      # (block_b, 1) f32
    t = s - m                                                   # (block_b, C) f32
    e = jnp.exp(t)
    lse_minus_m = jnp.log(jnp.sum(e, axis=-1, keepdims=True))   # (block_b, 1)

    cols = jax.lax.broadcasted_iota(jnp.int32, t.shape, 1)      # (block_b, C)
    picked_minus_m = jnp.sum(
        jnp.where(cols == lab, t, jnp.float32(0.0)), axis=-1, keepdims=True
    )                                                           # (block_b, 1)

    row_loss = jnp.where(valid, lse_minus_m - picked_minus_m, jnp.float32(0.0))
    out_ref[...] = row_loss


def _vmem_capacity_bytes():
    try:
        return int(pltpu.get_tpu_info().vmem_capacity_bytes)
    except Exception:
        return 64 * 1024 * 1024  # conservative default (v7x-like)


def partial_label_loss(score, label, *, block_b=None):
    """score: [B, C] (any float dtype), label: [B] integer. Returns scalar f32."""
    assert score.shape[0] == label.shape[0]
    B, C = score.shape
    itemsize = jnp.dtype(score.dtype).itemsize

    # Packed-sublane alignment: 8 rows for f32, 16 for bf16, 32 for 8-bit.
    sub = max(8, 32 // max(itemsize, 1))

    # Generation-aware tiling: size block_b from the f32 working-tile bytes so
    # the in-kernel f32 temporaries stay bounded regardless of input dtype.
    vmem_cap = _vmem_capacity_bytes()
    if vmem_cap >= 100 * 1024 * 1024:            # v5e / v6e: 128 MiB VMEM
        target_bytes = 8 * 1024 * 1024
        vmem_limit = 64 * 1024 * 1024
    else:                                         # v7x (64 MiB per TC) / unknown
        target_bytes = 4 * 1024 * 1024
        vmem_limit = 48 * 1024 * 1024

    if block_b is None:
        block_b = max(sub, target_bytes // max(C * 4, 1))
    block_b = max(sub, (block_b // sub) * sub)    # sublane/packing aligned
    b_cap = pl.cdiv(B, sub) * sub                 # don't exceed the rounded batch
    block_b = min(block_b, b_cap)

    num_tiles = pl.cdiv(B, block_b)

    label2d = label.astype(jnp.int32).reshape(B, 1)

    kernel = functools.partial(
        _partial_label_loss_kernel, block_b=block_b, total_b=B
    )

    row_losses = pl.pallas_call(
        kernel,
        out_shape=jax.ShapeDtypeStruct((B, 1), jnp.float32),
        grid=(num_tiles,),
        in_specs=[
            pl.BlockSpec((block_b, C), lambda i: (i, 0)),   # score tile (VMEM)
            pl.BlockSpec((block_b, 1), lambda i: (i, 0)),   # label tile (VMEM)
        ],
        out_specs=pl.BlockSpec((block_b, 1), lambda i: (i, 0)),
        compiler_params=pltpu.CompilerParams(
            dimension_semantics=("parallel",),   # independent tiles -> 2-TC split on v7x
            vmem_limit_bytes=vmem_limit,
        ),
    )(score, label2d)

    # Pairwise reduction in the wrapper; divide by the GLOBAL batch size.
    return jnp.sum(row_losses) / jnp.float32(B)


def _reference(score, label):
    s = score.astype(jnp.float32)
    logp = jax.nn.log_softmax(s, axis=1)
    return -jnp.mean(logp[jnp.arange(score.shape[0]), label])


if __name__ == "__main__":
    key = jax.random.PRNGKey(0)
    k1, k2, k3, k4, k5, k6 = jax.random.split(key, 6)

    # Case 1: small, single tile, f32.
    B, C = 8, 32
    score = jax.random.normal(k1, (B, C), dtype=jnp.float32)
    label = jax.random.randint(k2, (B,), 0, C, dtype=jnp.int32)
    loss = partial_label_loss(score, label)
    jax.block_until_ready(loss)
    ref = _reference(score, label)
    assert jnp.allclose(loss, ref, atol=1e-5, rtol=1e-5), (loss, ref)

    # Case 2: ragged batch, multiple tiles (forces boundary block + mask path).
    B2, C2 = 37, 96
    score2 = jax.random.normal(k3, (B2, C2), dtype=jnp.float32) * 5.0
    label2 = jax.random.randint(k4, (B2,), 0, C2, dtype=jnp.int32)
    loss2 = partial_label_loss(score2, label2, block_b=8)
    jax.block_until_ready(loss2)
    ref2 = _reference(score2, label2)
    assert jnp.allclose(loss2, ref2, atol=1e-4, rtol=1e-5), (loss2, ref2)

    # Case 3: bf16 input (exercises the f32-cast-before-shift path, sub=16).
    B3, C3 = 24, 128
    score3 = (jax.random.normal(k5, (B3, C3), dtype=jnp.float32) * 4.0).astype(jnp.bfloat16)
    label3 = jax.random.randint(k6, (B3,), 0, C3, dtype=jnp.int32)
    loss3 = partial_label_loss(score3, label3, block_b=16)
    jax.block_until_ready(loss3)
    ref3 = _reference(score3, label3)
    assert jnp.allclose(loss3, ref3, atol=1e-4, rtol=1e-4), (loss3, ref3)

    print("KERNEL_OK")
</pallas_src>

<mosaic_0001>
module attributes {stable_mosaic.version = 11 : i64} {
  func.func @_partial_label_loss_kernel(%arg0: i32, %arg1: memref<8x32xf32, #tpu.memory_space<vmem>>, %arg2: memref<8x1xi32, #tpu.memory_space<vmem>>, %arg3: memref<8x1xf32, #tpu.memory_space<vmem>>) attributes {dimension_semantics = [#tpu.dimension_semantics<parallel>], iteration_bounds = array<i64: 1>, scalar_prefetch = 0 : i64, scratch_operands = 0 : i64, tpu.core_type = #tpu.core_type<tc>, window_params = [{transform_indices = @transform_0, window_bounds = array<i64: 8, 32>}, {transform_indices = @transform_1, window_bounds = array<i64: 8, 1>}, {transform_indices = @transform_2, window_bounds = array<i64: 8, 1>}]} {
    %c0 = arith.constant 0 : index
    %c0_0 = arith.constant 0 : index
    %0 = vector.load %arg1[%c0, %c0_0] : memref<8x32xf32, #tpu.memory_space<vmem>>, vector<8x32xf32>
    %c0_1 = arith.constant 0 : index
    %c0_2 = arith.constant 0 : index
    %1 = vector.load %arg2[%c0_1, %c0_2] : memref<8x1xi32, #tpu.memory_space<vmem>>, vector<8x1xi32>
    %2 = tpu.iota {dimensions = array<i32: 0>} : vector<8x1xi32>
    %c8_i32 = arith.constant 8 : i32
    %3 = arith.muli %arg0, %c8_i32 : i32
    %4 = vector.broadcast %3 : i32 to vector<8x1xi32>
    %5 = arith.addi %2, %4 : vector<8x1xi32>
    %c8_i32_3 = arith.constant 8 : i32
    %6 = vector.broadcast %c8_i32_3 : i32 to vector<8x1xi32>
    %7 = arith.cmpi slt, %5, %6 : vector<8x1xi32>
    %cst = arith.constant dense<0xFF800000> : vector<8xf32>
    %8 = vector.multi_reduction <maximumf>, %0, %cst [1] : vector<8x32xf32> to vector<8xf32>
    %9 = vector.shape_cast %8 : vector<8xf32> to vector<8x1xf32>
    %10 = vector.broadcast %9 : vector<8x1xf32> to vector<8x32xf32>
    %11 = arith.subf %0, %10 : vector<8x32xf32>
    %12 = math.exp %11 : vector<8x32xf32>
    %cst_4 = arith.constant dense<0.000000e+00> : vector<8xf32>
    %13 = vector.multi_reduction <add>, %12, %cst_4 [1] : vector<8x32xf32> to vector<8xf32>
    %14 = vector.shape_cast %13 : vector<8xf32> to vector<8x1xf32>
    %15 = math.log %14 : vector<8x1xf32>
    %16 = tpu.iota {dimensions = array<i32: 1>} : vector<8x32xi32>
    %17 = vector.broadcast %1 : vector<8x1xi32> to vector<8x32xi32>
    %18 = arith.cmpi eq, %16, %17 : vector<8x32xi32>
    %cst_5 = arith.constant 0.000000e+00 : f32
    %19 = vector.broadcast %cst_5 : f32 to vector<8x32xf32>
    %20 = arith.select %18, %11, %19 : vector<8x32xi1>, vector<8x32xf32>
    %cst_6 = arith.constant dense<0.000000e+00> : vector<8xf32>
    %21 = vector.multi_reduction <add>, %20, %cst_6 [1] : vector<8x32xf32> to vector<8xf32>
    %22 = vector.shape_cast %21 : vector<8xf32> to vector<8x1xf32>
    %23 = arith.subf %15, %22 : vector<8x1xf32>
    %cst_7 = arith.constant 0.000000e+00 : f32
    %24 = vector.broadcast %cst_7 : f32 to vector<8x1xf32>
    %25 = arith.select %7, %23, %24 : vector<8x1xi1>, vector<8x1xf32>
    %c0_8 = arith.constant 0 : index
    %c0_9 = arith.constant 0 : index
    %26 = vector.load %arg3[%c0_8, %c0_9] : memref<8x1xf32, #tpu.memory_space<vmem>>, vector<8x1xf32>
    tpu.vector_store %arg3[%c0_8, %c0_9], %25 {strides = array<i32>} : memref<8x1xf32, #tpu.memory_space<vmem>>, vector<8x1xf32>,
    return
  }
  func.func @transform_0(%arg0: i32) -> (i32, i32) {
    %c0_i32 = arith.constant 0 : i32
    %c0_i32_0 = arith.constant 0 : i32
    return %arg0, %c0_i32 : i32, i32
  }
  func.func @transform_1(%arg0: i32) -> (i32, i32) {
    %c0_i32 = arith.constant 0 : i32
    %c0_i32_0 = arith.constant 0 : i32
    return %arg0, %c0_i32 : i32, i32
  }
  func.func @transform_2(%arg0: i32) -> (i32, i32) {
    %c0_i32 = arith.constant 0 : i32
    %c0_i32_0 = arith.constant 0 : i32
    return %arg0, %c0_i32 : i32, i32
  }
}

</mosaic_0001>

<bundles_post_ra>
// kernel: tpu_custom_call.1
= control target key start
LH: loop header
LB: loop body
LE: loop exit
PB: predicated region body
PF: predicated region fallthrough
CT: control target
= control target key end

     0   :  { %vm19_vm0 = vcmask 261120   ;;  %v55_v1 = vmov 0   ;;  %v31_v9 = vlaneseq  ;;  %vm43_vm2 = vcmask 7168   ;;  %s83_s0 = inlined_call_operand.vmem [shape: f32[8,32], index: 0, kind: input, shape index: {}]   ;;  %s84_s1 = inlined_call_operand.vmem [shape: s32[8,1], index: 1, kind: input, shape index: {}]   ;;  %s85_s2 = inlined_call_operand.vmem [shape: f32[8,1], index: 2, kind: output, shape index: {}]  }
   0x1   :  { %v11_v0 = vld [vmem:[%s83_s0] sm:$0xff]  ;;  %50 = vset.pattern.permute.xlu0 %v55_v1 }
   0x2   :  { %v20_v2 = vsel %vm19_vm0, %v11_v0, -inf  ;;  %v12_v3 = vld [vmem:[%s84_s1] sm:$0xff]  ;;  %v32_v10 = vand.u32 127, %v31_v9 }
   0x3   :  { %21 = vmax.xlane.f32.xlu0 %v20_v2 }
  0x17   :  { %34 = vperm.xlu0 %50, %v12_v3  }
  0x76   :  { %v22_v4 = vpop.xlane.xlu0 %21 }
  0x77   :  { %v23_v5 = vsub.f32 %v11_v0, %v22_v4 }
  0x79   :  { %v24_v6 = vmul.f32 1.442695, %v23_v5 }
  0x7b   :  { %51 = vpow2.f32 %v24_v6 }
  0x81   :  { %v52_v7 = vpop.eup %51 }
  0x82   :  { %v26_v8 = vsel %vm19_vm0, %v52_v7, 0.0 }
  0x83   :  { %27 = vadd.xlane.f32.xlu1 %v26_v8 }
  0x89   :  { %v35_v11 = vpop.permute.xlu0 %34 }
  0x8a   :  { %vm36_vm1 = vcmp.eq.s32.totalorder %v32_v10, %v35_v11 }
  0x8b   :  { %v37_v12 = vsel %vm36_vm1, %v23_v5, 0.0 }
  0x8c   :  { %v38_v13 = vsel %vm19_vm0, %v37_v12, 0.0 }
  0x8d   :  { %39 = vadd.xlane.f32.xlu1 %v38_v13 }
  0xf6   :  { %v28_v14 = vpop.xlane.xlu1 %27 }
  0xf7   :  { %53 = vlog2.f32 %v28_v14 }
  0xfd   :  { %v54_v15 = vpop.eup %53 }
  0xfe   :  { %v30_v16 = vmul.f32 0.6931472, %v54_v15 }
 0x100   :  { %v40_v17 = vpop.xlane.xlu1 %39 }
 0x101   :  { %v41_v18 = vsub.f32 %v30_v16, %v40_v17 }
 0x103   :  { %44 = vst.msk [vmem:[%s85_s2] sm:$0xff] %vm43_vm2, %v41_v18 }

</bundles_post_ra>
